<compile_context>
chip_gen: v7x
topology: tpu7x:2x2x1
jax: 0.10.0
libtpu: 0.0.40
codegen_flags: <defaults>
</compile_context>

<pallas_src>
import functools

import jax
import jax.numpy as jnp
from jax.experimental import pallas as pl
from jax.experimental.pallas import tpu as pltpu

LANE = 128
_W_CANDIDATES = (4096, 2048, 1024, 512, 256, 128)


def _myfloor_kernel(up_ref, x_ref, o_ref, *, t):
    """Elementwise y = clamp(floor((x/up)*t + 0.5)/t, 0, 1) * up.

    Partial edge blocks may compute on padded/stale lanes; every op here is
    total (floor/clip of garbage cannot trap) and the masked store drops those
    lanes, so this is safe — keep it that way if editing.
    """
    up = up_ref[0]                                   # scalar param from SMEM
    x = x_ref[...].astype(jnp.float32)               # f32 internal math
    y = x / up                                       # same op order as PyTorch
    y = jnp.floor(y * t + 0.5) / t
    y = jnp.clip(y, 0.0, 1.0)
    o_ref[...] = (y * up).astype(o_ref.dtype)


def _tile_params(rows, W, itemsize):
    """Byte-sized, generation-aware row-block selection."""
    try:
        vmem_cap = int(pltpu.get_tpu_info().vmem_capacity_bytes)
    except Exception:
        vmem_cap = 64 << 20                          # assume v7x-sized VMEM
    if vmem_cap >= (100 << 20):                      # v5e / v6e: 128 MiB per TC
        target_tile_bytes, vmem_limit = 8 << 20, 48 << 20
    else:                                            # v7x: 64 MiB per TC
        target_tile_bytes, vmem_limit = 4 << 20, 32 << 20

    # Sublane packing: blocks must be a multiple of 8 (f32) / 16 (bf16) /
    # 32 (int8) rows, or equal the full row extent.
    min_rows = 8 * max(1, 4 // itemsize)
    target_rows = max(min_rows, target_tile_bytes // (W * itemsize))
    target_rows = (target_rows // min_rows) * min_rows

    if target_rows >= rows:
        # Small/medium tensor: still aim for >=4 blocks so both v7x
        # TensorCores get work under dimension_semantics=("parallel",).
        want = pl.cdiv(rows, 4)
        block_rows = min(rows, ((want + min_rows - 1) // min_rows) * min_rows)
    else:
        block_rows = target_rows
    return block_rows, vmem_limit


def _myfloor_pallas_2d(x2, up_arr, t):
    rows, W = x2.shape
    itemsize = jnp.dtype(x2.dtype).itemsize
    block_rows, vmem_limit = _tile_params(rows, W, itemsize)
    grid = (pl.cdiv(rows, block_rows),)
    return pl.pallas_call(
        functools.partial(_myfloor_kernel, t=float(t)),
        out_shape=jax.ShapeDtypeStruct((rows, W), x2.dtype),
        grid=grid,
        in_specs=[
            pl.BlockSpec(memory_space=pltpu.SMEM),             # scalar `up`
            pl.BlockSpec((block_rows, W), lambda i: (i, 0)),    # x tile
        ],
        out_specs=pl.BlockSpec((block_rows, W), lambda i: (i, 0)),
        compiler_params=pltpu.CompilerParams(
            dimension_semantics=("parallel",),
            vmem_limit_bytes=vmem_limit,
        ),
    )(up_arr, x2)


def _myfloor_jnp(x, up, t):
    """Plain-jnp fallback for tiny / unaligned tails (XLA fuses it)."""
    y = x.astype(jnp.float32) / up
    y = jnp.floor(y * t + 0.5) / t
    y = jnp.clip(y, 0.0, 1.0)
    return (y * up).astype(x.dtype)


def myfloor_forward(x, up, t=32):
    """Pallas implementation of MyFloor.forward; `x` may have any shape."""
    orig_shape = x.shape
    n = x.size
    if n == 0:
        return x
    up_arr = jnp.asarray(up, dtype=jnp.float32).reshape(1)
    flat = x.reshape(-1)

    if n % LANE == 0:
        # Aligned: pure reshape into a lane-dense slab, no pad / slice copies.
        W = next(c for c in _W_CANDIDATES if n % c == 0)
        out2 = _myfloor_pallas_2d(flat.reshape(n // W, W), up_arr, t)
        return out2.reshape(orig_shape)

    # Misaligned: kernel on the lane-aligned bulk, jnp for the <128-elem tail.
    n_main = (n // LANE) * LANE
    if n_main == 0:
        return _myfloor_jnp(flat, up_arr[0], t).reshape(orig_shape)
    W = next(c for c in _W_CANDIDATES if n_main % c == 0)
    main_out = _myfloor_pallas_2d(
        flat[:n_main].reshape(n_main // W, W), up_arr, t).reshape(-1)
    tail_out = _myfloor_jnp(flat[n_main:], up_arr[0], t)
    return jnp.concatenate([main_out, tail_out]).reshape(orig_shape)


def myfloor_reference(x, up, t=32):
    """Pure-JAX transcription of the PyTorch MyFloor.forward."""
    x = x / up
    x = jnp.floor(x * t + 0.5) / t
    x = jnp.clip(x, 0.0, 1.0)
    return x * up


if __name__ == "__main__":
    # MyFloor.__init__(up=8.0, t=32): `up` is a learnable scalar parameter.
    up_param = jnp.array([8.0], dtype=jnp.float32)
    t = 32

    key = jax.random.PRNGKey(0)
    # Small NCHW activation: batch=2, channels=4, spatial 16x16.
    x = jax.random.uniform(key, (2, 4, 16, 16), dtype=jnp.float32,
                           minval=-2.0, maxval=10.0)

    y = jax.block_until_ready(myfloor_forward(x, up_param, t=t))
    y_ref = myfloor_reference(x, up_param[0], t=t)

    assert y.shape == x.shape and y.dtype == x.dtype

    # Robust check: exact (to f32 rounding) everywhere except inputs that sit
    # within float rounding of a quantization-bin boundary, where a 1-ulp
    # difference in the division may legitimately flip floor() by one level
    # (an output difference of exactly up/t).
    diff = jnp.abs(y - y_ref)
    pre = x / up_param[0] * t + 0.5
    near_boundary = jnp.abs(pre - jnp.round(pre)) < 1e-3
    step = up_param[0] / t
    ok = (diff <= 1e-6) | (near_boundary & (diff <= step + 1e-6))
    assert bool(jnp.all(ok)), "mismatch vs reference"

    print("KERNEL_OK")
</pallas_src>

<mosaic_0001>
module attributes {stable_mosaic.version = 11 : i64} {
  func.func @_myfloor_kernel(%arg0: i32, %arg1: memref<1xf32, #tpu.memory_space<smem>>, %arg2: memref<1x2048xf32, #tpu.memory_space<vmem>>, %arg3: memref<1x2048xf32, #tpu.memory_space<vmem>>) attributes {dimension_semantics = [#tpu.dimension_semantics<parallel>], iteration_bounds = array<i64: 1>, scalar_prefetch = 0 : i64, scratch_operands = 0 : i64, tpu.core_type = #tpu.core_type<tc>, window_params = [{transform_indices = @transform_0, window_bounds = array<i64: 1>}, {transform_indices = @transform_1, window_bounds = array<i64: 1, 2048>}, {transform_indices = @transform_2, window_bounds = array<i64: 1, 2048>}]} {
    %c0 = arith.constant 0 : index
    %0 = memref.load %arg1[%c0] : memref<1xf32, #tpu.memory_space<smem>>
    %c0_0 = arith.constant 0 : index
    %c0_1 = arith.constant 0 : index
    %1 = vector.load %arg2[%c0_0, %c0_1] : memref<1x2048xf32, #tpu.memory_space<vmem>>, vector<1x2048xf32>
    %2 = vector.broadcast %0 : f32 to vector<1x2048xf32>
    %3 = arith.divf %1, %2 : vector<1x2048xf32>
    %cst = arith.constant 3.200000e+01 : f32
    %4 = vector.broadcast %cst : f32 to vector<1x2048xf32>
    %5 = arith.mulf %3, %4 : vector<1x2048xf32>
    %cst_2 = arith.constant 5.000000e-01 : f32
    %6 = vector.broadcast %cst_2 : f32 to vector<1x2048xf32>
    %7 = arith.addf %5, %6 : vector<1x2048xf32>
    %8 = math.floor %7 : vector<1x2048xf32>
    %cst_3 = arith.constant 3.200000e+01 : f32
    %9 = vector.broadcast %cst_3 : f32 to vector<1x2048xf32>
    %10 = arith.divf %8, %9 : vector<1x2048xf32>
    %cst_4 = arith.constant 0.000000e+00 : f32
    %cst_5 = arith.constant 1.000000e+00 : f32
    %11 = vector.broadcast %cst_4 : f32 to vector<1x2048xf32>
    %12 = arith.maximumf %11, %10 : vector<1x2048xf32>
    %13 = vector.broadcast %cst_5 : f32 to vector<1x2048xf32>
    %14 = arith.minimumf %13, %12 : vector<1x2048xf32>
    %15 = vector.broadcast %0 : f32 to vector<1x2048xf32>
    %16 = arith.mulf %14, %15 : vector<1x2048xf32>
    %c0_6 = arith.constant 0 : index
    %c0_7 = arith.constant 0 : index
    %17 = vector.load %arg3[%c0_6, %c0_7] : memref<1x2048xf32, #tpu.memory_space<vmem>>, vector<1x2048xf32>
    tpu.vector_store %arg3[%c0_6, %c0_7], %16 {strides = array<i32>} : memref<1x2048xf32, #tpu.memory_space<vmem>>, vector<1x2048xf32>,
    return
  }
  func.func @transform_0(%arg0: i32) -> i32 {
    %c0_i32 = arith.constant 0 : i32
    %c0_i32_0 = arith.constant 0 : i32
    return %c0_i32 : i32
  }
  func.func @transform_1(%arg0: i32) -> (i32, i32) {
    %c0_i32 = arith.constant 0 : i32
    %c0_i32_0 = arith.constant 0 : i32
    return %arg0, %c0_i32 : i32, i32
  }
  func.func @transform_2(%arg0: i32) -> (i32, i32) {
    %c0_i32 = arith.constant 0 : i32
    %c0_i32_0 = arith.constant 0 : i32
    return %arg0, %c0_i32 : i32, i32
  }
}

</mosaic_0001>

<bundles_post_ra>
// kernel: tpu_custom_call.1
= control target key start
LH: loop header
LB: loop body
LE: loop exit
PB: predicated region body
PF: predicated region fallthrough
CT: control target
= control target key end

     0   :  { %8 = vsyncpa [#allocation4], 0  ;;  %s160_s0 = inlined_call_operand.<no memory space> [shape: f32[1], index: 0, kind: input, shape index: {}]   ;;  %s161_s1 = inlined_call_operand.hbm [shape: f32[1,2048], index: 1, kind: input, shape index: {}]   ;;  %s162_s2 = inlined_call_operand.hbm [shape: f32[1,2048], index: 2, kind: output, shape index: {}]  }
   0x1   :  { %9 = vsyncpa [#allocation5], 0  ;;  %s116_s9 = smov [#allocation3]   ;;  %s68_s13 = scalar_lea.hbm %s161_s1, 256 }
   0x2   :  { %s18_s10 = sshll.u32 %s116_s9, 4  ;;  %p69_p0 = scmp.ne.s32.totalorder %s161_s1, %s68_s13  ;;  %s19_s10 = int_to_ptr.vmem [resolvable:$true] %s18_s10 }
   0x3   :  { %p72_p1 = scmp.lt.u32.totalorder %s68_s13, %s161_s1 }
   0x5   :  { %p74_p2 = pnand %p72_p1, %p69_p0 }
   0x7   :  { %77 = shalt.err (!%p74_p2)
}
   0x8   :  { %s78_s18 = scalar_lea.vmem %s19_s10, 256  ;;  %p83_p4 = scmp.lt.s32.totalorder %s19_s10, %s19_s10 }
   0x9   :  { %p79_p3 = scmp.ne.s32.totalorder %s19_s10, %s78_s18  ;;  %p84_p5 = scmp.lt.s32.totalorder %s78_s18, %s78_s18 }
   0xb   :  { %p85_p6 = por %p84_p5, %p83_p4 }
   0xd   :  { %p86_p7 = pnand %p85_p6, %p79_p3 }
   0xf   :  { %89 = shalt.err (!%p86_p7)
}
  0x10   :  { %21 = dma.hbm_to_vmem [thread:$0]  %s161_s1, 256, %s19_s10, [#allocation4]  }
  0x11   :  { %112 = dma.done.wait [#allocation4], 256  }
  0x12   :  { %113 = vsyncadd [#allocation4], 4294967040  ;;  %v28_v0 = vstv %s160_s0  ;;  %v26_v1 = vld [vmem:[#allocation3] sm:$0xff]  ;;  %v27_v2 = vld [vmem:[#allocation3 + $0x8] sm:$0xff]  ;;  %s117_s1 = smov [#allocation6]  }
  0x13   :  { %66 = vrcp.f32 %v28_v0  ;;  %s55_s23 = sshll.u32 %s117_s1, 4  ;;  %s56_s23 = int_to_ptr.vmem [resolvable:$true] %s55_s23 }
  0x14   :  { %s90_s0 = scalar_lea.vmem %s56_s23, 256  ;;  %p95_p9 = scmp.lt.s32.totalorder %s56_s23, %s56_s23 }
  0x15   :  { %p91_p8 = scmp.ne.s32.totalorder %s56_s23, %s90_s0  ;;  %p96_p10 = scmp.lt.s32.totalorder %s90_s0, %s90_s0 }
  0x17   :  { %p97_p11 = por %p96_p10, %p95_p9 }
  0x19   :  { %p98_p12 = pnand %p97_p11, %p91_p8 }
  0x1d   :  { %v67_v3 = vpop.eup %66 }
  0x1e   :  { %v30_v4 = vmul.f32 %v67_v3, %v26_v1  ;;  %v31_v5 = vmul.f32 %v67_v3, %v27_v2 }
  0x20   :  { %v32_v6 = vmul.f32 32.0, %v30_v4  ;;  %v33_v7 = vmul.f32 32.0, %v31_v5 }
  0x22   :  { %v34_v8 = vadd.f32 0.5, %v32_v6  ;;  %v35_v9 = vadd.f32 0.5, %v33_v7 }
  0x24   :  { %v36_v10 = vfloor.f32 %v34_v8  ;;  %v37_v11 = vfloor.f32 %v35_v9 }
  0x26   :  { %v39_v12 = vmul.f32 0.03125, %v36_v10  ;;  %v40_v13 = vmul.f32 0.03125, %v37_v11 }
  0x28   :  { %v41_v14 = vmax.f32 %v39_v12, 0.0  ;;  %v42_v15 = vmax.f32 %v40_v13, 0.0 }
  0x2a   :  { %v43_v16 = vmin.f32 %v41_v14, 1.0  ;;  %v44_v17 = vmin.f32 %v42_v15, 1.0 }
  0x2c   :  { %v45_v18 = vmul.f32 %v43_v16, %v28_v0  ;;  %v46_v19 = vmul.f32 %v44_v17, %v28_v0 }
  0x2e   :  { %47 = vst [vmem:[#allocation6] sm:$0xff] %v45_v18  ;;  %48 = vst [vmem:[#allocation6 + $0x8] sm:$0xff] %v46_v19 }
  0x2f   :  { %101 = shalt.err (!%p98_p12)
}
  0x30   :  { %s102_s26 = scalar_lea.hbm %s162_s2, 256 }
  0x31   :  { %p103_p13 = scmp.ne.s32.totalorder %s162_s2, %s102_s26  ;;  %p106_p0 = scmp.lt.u32.totalorder %s102_s26, %s162_s2 }
  0x33   :  { %p108_p1 = pnand %p106_p0, %p103_p13 }
  0x35   :  { %111 = shalt.err (!%p108_p1)
}
  0x36   :  { %58 = dma.vmem_to_hbm [thread:$0]  %s56_s23, 256, %s162_s2, [#allocation5]  }
  0x37   :  { %114 = dma.done.wait [#allocation5], 256  }
  0x38   :  { %115 = vsyncadd [#allocation5], 4294967040 }
  0x39   :  { %62 = vsyncpa [#allocation4], 1 }
  0x3a   :  { %63 = vsyncpa [#allocation5], 1 }

</bundles_post_ra>
